<compile_context>
chip_gen: v7x
topology: tpu7x:2x2x1
jax: 0.10.0
libtpu: 0.0.40
codegen_flags: <defaults>
</compile_context>

<pallas_src>
import functools
import math

import jax
import jax.numpy as jnp
from jax.experimental import pallas as pl
from jax.experimental.pallas import tpu as pltpu


def _sigmoid(x):
    # sigmoid(x) == 0.5 * (tanh(x / 2) + 1): single EUP op per element.
    return 0.5 * (jnp.tanh(0.5 * x) + 1.0)


def _round_up(n, m):
    return ((n + m - 1) // m) * m


def _make_seq_kernel(has_nin, has_nhid):
    """Build the sequence kernel; noise refs are only present when used."""

    def kernel(*refs):
        it = iter(refs)
        x_ref = next(it)                      # (1, Bp, I)   current timestep
        h0_ref = next(it)                     # (Bp, H)      initial hidden
        c0_ref = next(it)                     # (Bp, H)      initial cell
        wih_ref = next(it)                    # (I, 4H)      resident in VMEM
        whh_ref = next(it)                    # (H, 4H)      resident in VMEM
        b_ref = next(it)                      # (1, 4H)      b_ih + b_hh
        nin_ref = next(it) if has_nin else None    # (Bp, I)
        nhid_ref = next(it) if has_nhid else None  # (Bp, H)
        hseq_ref = next(it)                   # (1, Bp, H)   per-step output
        cfin_ref = next(it)                   # (Bp, H)      final cell state
        h_sc = next(it)                       # (Bp, H) f32  persistent scratch
        c_sc = next(it)                       # (Bp, H) f32  persistent scratch

        t = pl.program_id(0)
        T = pl.num_programs(0)
        H = h_sc.shape[-1]

        @pl.when(t == 0)
        def _():
            h_sc[...] = h0_ref[...].astype(jnp.float32)
            c_sc[...] = c0_ref[...].astype(jnp.float32)

        # Variational dropout masks, applied in f32 (v5e-safe elementwise).
        xp = x_ref[0].astype(jnp.float32)
        if has_nin:
            xp = xp * nin_ref[...].astype(jnp.float32)
        hp = h_sc[...]
        if has_nhid:
            hp = hp * nhid_ref[...].astype(jnp.float32)

        # Two MXU matmuls against resident weights; f32 accumulation.
        cd = wih_ref.dtype
        gates = (jnp.dot(xp.astype(cd), wih_ref[...],
                         preferred_element_type=jnp.float32)
                 + jnp.dot(hp.astype(cd), whh_ref[...],
                           preferred_element_type=jnp.float32)
                 + b_ref[...].astype(jnp.float32))

        ingate     = _sigmoid(gates[:, 0 * H:1 * H])
        forgetgate = _sigmoid(gates[:, 1 * H:2 * H])
        cellgate   = jnp.tanh(gates[:, 2 * H:3 * H])
        outgate    = _sigmoid(gates[:, 3 * H:4 * H])

        cy = forgetgate * c_sc[...] + ingate * cellgate
        hy = outgate * jnp.tanh(cy)

        # Carry state in VMEM scratch; stream per-step hidden out.
        h_sc[...] = hy
        c_sc[...] = cy
        hseq_ref[0] = hy.astype(hseq_ref.dtype)

        @pl.when(t == T - 1)
        def _():
            cfin_ref[...] = cy.astype(cfin_ref.dtype)

    return kernel


def var_fast_lstm_sequence(x_seq, hx, weight_ih, weight_hh, bias_ih=None,
                           bias_hh=None, noise_in=None, noise_hidden=None,
                           compute_dtype=None):
    """Run the VarFastLSTMCell recurrence over a whole sequence in one kernel.

    x_seq: (T, B, I); hx = (h0, c0) each (B, H).
    weight_ih: (4H, I), weight_hh: (4H, H) in PyTorch layout.
    Returns (h_seq (T, B, H), (h_T, c_T)).
    """
    h0, c0 = hx
    T, B, I = x_seq.shape
    H = h0.shape[-1]
    out_dtype = h0.dtype
    cd = jnp.dtype(compute_dtype) if compute_dtype is not None else jnp.dtype(x_seq.dtype)

    # One-time weight prep (outside the time loop): pre-transpose to (K, 4H),
    # cast to the MXU compute dtype, pre-add biases.
    wih_t = weight_ih.T.astype(cd)                       # (I, 4H)
    whh_t = weight_hh.T.astype(cd)                       # (H, 4H)
    if bias_ih is None and bias_hh is None:
        b = jnp.zeros((1, 4 * H), jnp.float32)
    else:
        b_i = bias_ih if bias_ih is not None else 0.0
        b_h = bias_hh if bias_hh is not None else 0.0
        b = jnp.asarray(b_i + b_h, jnp.float32).reshape(1, 4 * H)

    # Pad batch to a sublane multiple so (Bp, *) tiles are unmasked.
    Bp = max(8, _round_up(B, 8))
    pad_b = Bp - B
    x_p = jnp.pad(x_seq, ((0, 0), (0, pad_b), (0, 0)))
    h0_p = jnp.pad(h0, ((0, pad_b), (0, 0)))
    c0_p = jnp.pad(c0, ((0, pad_b), (0, 0)))
    has_nin = noise_in is not None
    has_nhid = noise_hidden is not None
    nin_p = (jnp.pad(noise_in, ((0, pad_b), (0, 0)), constant_values=1.0)
             if has_nin else None)
    nhid_p = (jnp.pad(noise_hidden, ((0, pad_b), (0, 0)), constant_values=1.0)
              if has_nhid else None)

    const2 = lambda t: (0, 0)
    in_specs = [
        pl.BlockSpec((1, Bp, I), lambda t: (t, 0, 0)),   # x_t (streamed)
        pl.BlockSpec((Bp, H), const2),                   # h0 (resident)
        pl.BlockSpec((Bp, H), const2),                   # c0 (resident)
        pl.BlockSpec((I, 4 * H), const2),                # W_ih^T (resident)
        pl.BlockSpec((H, 4 * H), const2),                # W_hh^T (resident)
        pl.BlockSpec((1, 4 * H), const2),                # bias (resident)
    ]
    args = [x_p, h0_p, c0_p, wih_t, whh_t, b]
    if has_nin:
        in_specs.append(pl.BlockSpec((Bp, I), const2))
        args.append(nin_p)
    if has_nhid:
        in_specs.append(pl.BlockSpec((Bp, H), const2))
        args.append(nhid_p)

    out_specs = (
        pl.BlockSpec((1, Bp, H), lambda t: (t, 0, 0)),   # per-step hidden
        pl.BlockSpec((Bp, H), const2),                   # final cell state
    )
    out_shape = (
        jax.ShapeDtypeStruct((T, Bp, H), out_dtype),
        jax.ShapeDtypeStruct((Bp, H), out_dtype),
    )

    # Explicit VMEM budget: resident weights + double-buffered streamed tiles
    # + state scratch; clamp to 64 MiB so the same layout also fits v7x.
    est = ((I + H) * 4 * H * cd.itemsize                       # weights
           + 4 * H * 4                                          # bias
           + 2 * Bp * I * jnp.dtype(x_p.dtype).itemsize         # x_t (2 bufs)
           + 2 * Bp * H * jnp.dtype(out_dtype).itemsize         # h_t out (2 bufs)
           + 6 * Bp * H * 4                                     # h0/c0/cfin/scratch
           + Bp * (I + H) * 4)                                  # noise masks
    vmem_limit = int(min(64 * 2**20, max(32 * 2**20, 2 * est)))

    kernel = _make_seq_kernel(has_nin, has_nhid)
    h_seq_p, c_fin_p = pl.pallas_call(
        kernel,
        out_shape=out_shape,
        grid_spec=pltpu.PrefetchScalarGridSpec(
            num_scalar_prefetch=0,
            grid=(T,),
            in_specs=in_specs,
            out_specs=out_specs,
            scratch_shapes=[pltpu.VMEM((Bp, H), jnp.float32),
                            pltpu.VMEM((Bp, H), jnp.float32)],
        ),
        compiler_params=pltpu.CompilerParams(
            dimension_semantics=("arbitrary",),   # time is a true recurrence
            vmem_limit_bytes=vmem_limit,
        ),
    )(*args)

    h_seq = h_seq_p[:, :B, :]
    c_fin = c_fin_p[:B, :]
    return h_seq, (h_seq[-1], c_fin)


def var_fast_lstm_cell(x, hx, weight_ih, weight_hh, bias_ih=None, bias_hh=None,
                       noise_in=None, noise_hidden=None, compute_dtype=None):
    """Single-step VarFastLSTMCell forward (matches the PyTorch module)."""
    _, (h_T, c_T) = var_fast_lstm_sequence(
        x[None], hx, weight_ih, weight_hh, bias_ih, bias_hh,
        noise_in, noise_hidden, compute_dtype)
    return h_T, c_T


def init_params(key, input_size, hidden_size, dtype=jnp.float32):
    """Deterministic init matching VarFastLSTMCell.reset_parameters."""
    stdv = 1.0 / math.sqrt(hidden_size)
    k1, k2 = jax.random.split(key)
    weight_ih = jax.random.uniform(k1, (4 * hidden_size, input_size),
                                   dtype, minval=-stdv, maxval=stdv)
    weight_hh = jax.random.uniform(k2, (4 * hidden_size, hidden_size),
                                   dtype, minval=-stdv, maxval=stdv)
    bias_ih = jnp.zeros((4 * hidden_size,), dtype)   # nn.init.constant_(., 0.0)
    bias_hh = jnp.zeros((4 * hidden_size,), dtype)
    return weight_ih, weight_hh, bias_ih, bias_hh


def make_noise(key, batch_size, input_size, hidden_size, p_in, p_hidden,
               dtype=jnp.float32):
    """Deterministic equivalent of reset_noise(batch_size) in training mode."""
    k1, k2 = jax.random.split(key)
    noise_in = None
    noise_hidden = None
    if p_in:
        keep = jax.random.bernoulli(k1, 1.0 - p_in, (batch_size, input_size))
        noise_in = keep.astype(dtype) / (1.0 - p_in)
    if p_hidden:
        keep = jax.random.bernoulli(k2, 1.0 - p_hidden, (batch_size, hidden_size))
        noise_hidden = keep.astype(dtype) / (1.0 - p_hidden)
    return noise_in, noise_hidden


def reference_step(x, hx, w_ih, w_hh, b_ih, b_hh, noise_in, noise_hidden):
    """Pure-JAX single-step reference (semantics of the PyTorch cell)."""
    h, c = hx
    if noise_in is not None:
        x = x * noise_in
    if noise_hidden is not None:
        h = h * noise_hidden
    gates = x @ w_ih.T + h @ w_hh.T
    if b_ih is not None:
        gates = gates + b_ih
    if b_hh is not None:
        gates = gates + b_hh
    H = h.shape[-1]
    i, f, g, o = (gates[:, :H], gates[:, H:2 * H],
                  gates[:, 2 * H:3 * H], gates[:, 3 * H:])
    cy = jax.nn.sigmoid(f) * c + jax.nn.sigmoid(i) * jnp.tanh(g)
    hy = jax.nn.sigmoid(o) * jnp.tanh(cy)
    return hy, cy


def reference_sequence(x_seq, hx, w_ih, w_hh, b_ih, b_hh, noise_in, noise_hidden):
    h, c = hx
    outs = []
    for t in range(x_seq.shape[0]):
        h, c = reference_step(x_seq[t], (h, c), w_ih, w_hh, b_ih, b_hh,
                              noise_in, noise_hidden)
        outs.append(h)
    return jnp.stack(outs, 0), (h, c)


if __name__ == "__main__":
    key = jax.random.PRNGKey(0)
    k_param, k_x, k_h, k_c, k_noise = jax.random.split(key, 5)

    batch, input_size, hidden_size, seq_len = 2, 4, 32, 8
    p_in, p_hidden = 0.5, 0.5

    w_ih, w_hh, b_ih, b_hh = init_params(k_param, input_size, hidden_size)
    x_seq = jax.random.normal(k_x, (seq_len, batch, input_size), jnp.float32)
    h0 = jax.random.normal(k_h, (batch, hidden_size), jnp.float32)
    c0 = jax.random.normal(k_c, (batch, hidden_size), jnp.float32)
    noise_in, noise_hidden = make_noise(k_noise, batch, input_size,
                                        hidden_size, p_in, p_hidden)

    # 1) Full-sequence kernel (time loop inside the grid, weights resident), f32.
    h_seq, (h_T, c_T) = var_fast_lstm_sequence(
        x_seq, (h0, c0), w_ih, w_hh, b_ih, b_hh, noise_in, noise_hidden)
    jax.block_until_ready((h_seq, h_T, c_T))

    h_seq_ref, (h_T_ref, c_T_ref) = reference_sequence(
        x_seq, (h0, c0), w_ih, w_hh, b_ih, b_hh, noise_in, noise_hidden)
    assert jnp.allclose(h_seq, h_seq_ref, atol=1e-4, rtol=1e-4)
    assert jnp.allclose(h_T, h_T_ref, atol=1e-4, rtol=1e-4)
    assert jnp.allclose(c_T, c_T_ref, atol=1e-4, rtol=1e-4)
    assert h_seq.shape == (seq_len, batch, hidden_size)

    # 2) Single-step cell entry point (module forward), with dropout masks.
    hy, cy = var_fast_lstm_cell(x_seq[0], (h0, c0), w_ih, w_hh, b_ih, b_hh,
                                noise_in, noise_hidden)
    jax.block_until_ready((hy, cy))
    hy_ref, cy_ref = reference_step(x_seq[0], (h0, c0), w_ih, w_hh, b_ih, b_hh,
                                    noise_in, noise_hidden)
    assert jnp.allclose(hy, hy_ref, atol=1e-4, rtol=1e-4)
    assert jnp.allclose(cy, cy_ref, atol=1e-4, rtol=1e-4)

    # 3) Inference path (no dropout masks -> no-noise kernel variant).
    hy_nd, cy_nd = var_fast_lstm_cell(x_seq[0], (h0, c0), w_ih, w_hh, b_ih, b_hh)
    jax.block_until_ready((hy_nd, cy_nd))
    hy_nd_ref, cy_nd_ref = reference_step(x_seq[0], (h0, c0), w_ih, w_hh,
                                          b_ih, b_hh, None, None)
    assert jnp.allclose(hy_nd, hy_nd_ref, atol=1e-4, rtol=1e-4)
    assert jnp.allclose(cy_nd, cy_nd_ref, atol=1e-4, rtol=1e-4)

    # 4) bf16 MXU path (bf16 weights/operands, f32 accumulation + elementwise).
    h_seq_bf, (_, c_T_bf) = var_fast_lstm_sequence(
        x_seq, (h0, c0), w_ih, w_hh, b_ih, b_hh, noise_in, noise_hidden,
        compute_dtype=jnp.bfloat16)
    jax.block_until_ready((h_seq_bf, c_T_bf))
    assert jnp.allclose(h_seq_bf, h_seq_ref, atol=1e-1, rtol=1e-1)

    print("KERNEL_OK")
</pallas_src>

<mosaic_0001>
module attributes {stable_mosaic.version = 11 : i64} {
  func.func @kernel(%arg0: i32, %arg1: memref<1x8x4xf32, #tpu.memory_space<vmem>>, %arg2: memref<8x32xf32, #tpu.memory_space<vmem>>, %arg3: memref<8x32xf32, #tpu.memory_space<vmem>>, %arg4: memref<4x128xf32, #tpu.memory_space<vmem>>, %arg5: memref<32x128xf32, #tpu.memory_space<vmem>>, %arg6: memref<1x128xf32, #tpu.memory_space<vmem>>, %arg7: memref<8x4xf32, #tpu.memory_space<vmem>>, %arg8: memref<8x32xf32, #tpu.memory_space<vmem>>, %arg9: memref<1x8x32xf32, #tpu.memory_space<vmem>>, %arg10: memref<8x32xf32, #tpu.memory_space<vmem>>, %arg11: memref<8x32xf32, #tpu.memory_space<vmem>>, %arg12: memref<8x32xf32, #tpu.memory_space<vmem>>) attributes {dimension_semantics = [#tpu.dimension_semantics<arbitrary>], iteration_bounds = array<i64: 8>, scalar_prefetch = 0 : i64, scratch_operands = 2 : i64, tpu.core_type = #tpu.core_type<tc>, window_params = [{transform_indices = @transform_0, window_bounds = array<i64: 1, 8, 4>}, {pipeline_mode = #tpu.pipeline_mode<synchronous>, transform_indices = @transform_1, window_bounds = array<i64: 8, 32>}, {pipeline_mode = #tpu.pipeline_mode<synchronous>, transform_indices = @transform_2, window_bounds = array<i64: 8, 32>}, {pipeline_mode = #tpu.pipeline_mode<synchronous>, transform_indices = @transform_3, window_bounds = array<i64: 4, 128>}, {pipeline_mode = #tpu.pipeline_mode<synchronous>, transform_indices = @transform_4, window_bounds = array<i64: 32, 128>}, {pipeline_mode = #tpu.pipeline_mode<synchronous>, transform_indices = @transform_5, window_bounds = array<i64: 1, 128>}, {pipeline_mode = #tpu.pipeline_mode<synchronous>, transform_indices = @transform_6, window_bounds = array<i64: 8, 4>}, {pipeline_mode = #tpu.pipeline_mode<synchronous>, transform_indices = @transform_7, window_bounds = array<i64: 8, 32>}, {transform_indices = @transform_8, window_bounds = array<i64: 1, 8, 32>}, {pipeline_mode = #tpu.pipeline_mode<synchronous>, transform_indices = @transform_9, window_bounds = array<i64: 8, 32>}]} {
    %c0_i32 = arith.constant 0 : i32
    %0 = arith.cmpi eq, %arg0, %c0_i32 : i32
    %1 = arith.extui %0 : i1 to i32
    %c0_i32_0 = arith.constant 0 : i32
    %2 = arith.cmpi ne, %1, %c0_i32_0 : i32
    scf.if %2 {
      %c0_35 = arith.constant 0 : index
      %c0_36 = arith.constant 0 : index
      %58 = vector.load %arg2[%c0_35, %c0_36] : memref<8x32xf32, #tpu.memory_space<vmem>>, vector<8x32xf32>
      %c0_37 = arith.constant 0 : index
      %c0_38 = arith.constant 0 : index
      %59 = vector.load %arg11[%c0_37, %c0_38] : memref<8x32xf32, #tpu.memory_space<vmem>>, vector<8x32xf32>
      tpu.vector_store %arg11[%c0_37, %c0_38], %58 {strides = array<i32>} : memref<8x32xf32, #tpu.memory_space<vmem>>, vector<8x32xf32>,
      %c0_39 = arith.constant 0 : index
      %c0_40 = arith.constant 0 : index
      %60 = vector.load %arg3[%c0_39, %c0_40] : memref<8x32xf32, #tpu.memory_space<vmem>>, vector<8x32xf32>
      %c0_41 = arith.constant 0 : index
      %c0_42 = arith.constant 0 : index
      %61 = vector.load %arg12[%c0_41, %c0_42] : memref<8x32xf32, #tpu.memory_space<vmem>>, vector<8x32xf32>
      tpu.vector_store %arg12[%c0_41, %c0_42], %60 {strides = array<i32>} : memref<8x32xf32, #tpu.memory_space<vmem>>, vector<8x32xf32>,
    } else {
    }
    %c0 = arith.constant 0 : index
    %c0_1 = arith.constant 0 : index
    %c0_2 = arith.constant 0 : index
    %3 = vector.load %arg1[%c0, %c0_1, %c0_2] : memref<1x8x4xf32, #tpu.memory_space<vmem>>, vector<1x8x4xf32>
    %4 = vector.shape_cast %3 : vector<1x8x4xf32> to vector<8x4xf32>
    %c0_3 = arith.constant 0 : index
    %c0_4 = arith.constant 0 : index
    %5 = vector.load %arg7[%c0_3, %c0_4] : memref<8x4xf32, #tpu.memory_space<vmem>>, vector<8x4xf32>
    %6 = arith.mulf %4, %5 : vector<8x4xf32>
    %c0_5 = arith.constant 0 : index
    %c0_6 = arith.constant 0 : index
    %7 = vector.load %arg11[%c0_5, %c0_6] : memref<8x32xf32, #tpu.memory_space<vmem>>, vector<8x32xf32>
    %c0_7 = arith.constant 0 : index
    %c0_8 = arith.constant 0 : index
    %8 = vector.load %arg8[%c0_7, %c0_8] : memref<8x32xf32, #tpu.memory_space<vmem>>, vector<8x32xf32>
    %9 = arith.mulf %7, %8 : vector<8x32xf32>
    %c0_9 = arith.constant 0 : index
    %c0_10 = arith.constant 0 : index
    %10 = vector.load %arg4[%c0_9, %c0_10] : memref<4x128xf32, #tpu.memory_space<vmem>>, vector<4x128xf32>
    %cst = arith.constant dense<0.000000e+00> : vector<8x128xf32>
    %11 = tpu.matmul %6, %10, %cst {dimension_numbers = #tpu.dot_dimension_numbers<[1], [0], [0], [1], [0, 0, 1, 1], [], []>} : vector<8x4xf32>, vector<4x128xf32>, vector<8x128xf32> -> vector<8x128xf32>
    %c0_11 = arith.constant 0 : index
    %c0_12 = arith.constant 0 : index
    %12 = vector.load %arg5[%c0_11, %c0_12] : memref<32x128xf32, #tpu.memory_space<vmem>>, vector<32x128xf32>
    %cst_13 = arith.constant dense<0.000000e+00> : vector<8x128xf32>
    %13 = tpu.matmul %9, %12, %cst_13 {dimension_numbers = #tpu.dot_dimension_numbers<[1], [0], [0], [1], [0, 0, 1, 1], [], []>} : vector<8x32xf32>, vector<32x128xf32>, vector<8x128xf32> -> vector<8x128xf32>
    %14 = arith.addf %11, %13 : vector<8x128xf32>
    %c0_14 = arith.constant 0 : index
    %c0_15 = arith.constant 0 : index
    %15 = vector.load %arg6[%c0_14, %c0_15] : memref<1x128xf32, #tpu.memory_space<vmem>>, vector<1x128xf32>
    %16 = vector.broadcast %15 : vector<1x128xf32> to vector<8x128xf32>
    %17 = arith.addf %14, %16 : vector<8x128xf32>
    %18 = vector.extract_strided_slice %17 {offsets = [0, 0], sizes = [8, 32], strides = [1, 1]} : vector<8x128xf32> to vector<8x32xf32>
    %cst_16 = arith.constant 5.000000e-01 : f32
    %19 = vector.broadcast %cst_16 : f32 to vector<8x32xf32>
    %20 = arith.mulf %19, %18 : vector<8x32xf32>
    %21 = math.tanh %20 : vector<8x32xf32>
    %cst_17 = arith.constant 1.000000e+00 : f32
    %22 = vector.broadcast %cst_17 : f32 to vector<8x32xf32>
    %23 = arith.addf %21, %22 : vector<8x32xf32>
    %cst_18 = arith.constant 5.000000e-01 : f32
    %24 = vector.broadcast %cst_18 : f32 to vector<8x32xf32>
    %25 = arith.mulf %24, %23 : vector<8x32xf32>
    %26 = vector.extract_strided_slice %17 {offsets = [0, 32], sizes = [8, 32], strides = [1, 1]} : vector<8x128xf32> to vector<8x32xf32>
    %cst_19 = arith.constant 5.000000e-01 : f32
    %27 = vector.broadcast %cst_19 : f32 to vector<8x32xf32>
    %28 = arith.mulf %27, %26 : vector<8x32xf32>
    %29 = math.tanh %28 : vector<8x32xf32>
    %cst_20 = arith.constant 1.000000e+00 : f32
    %30 = vector.broadcast %cst_20 : f32 to vector<8x32xf32>
    %31 = arith.addf %29, %30 : vector<8x32xf32>
    %cst_21 = arith.constant 5.000000e-01 : f32
    %32 = vector.broadcast %cst_21 : f32 to vector<8x32xf32>
    %33 = arith.mulf %32, %31 : vector<8x32xf32>
    %34 = vector.extract_strided_slice %17 {offsets = [0, 64], sizes = [8, 32], strides = [1, 1]} : vector<8x128xf32> to vector<8x32xf32>
    %35 = math.tanh %34 : vector<8x32xf32>
    %36 = vector.extract_strided_slice %17 {offsets = [0, 96], sizes = [8, 32], strides = [1, 1]} : vector<8x128xf32> to vector<8x32xf32>
    %cst_22 = arith.constant 5.000000e-01 : f32
    %37 = vector.broadcast %cst_22 : f32 to vector<8x32xf32>
    %38 = arith.mulf %37, %36 : vector<8x32xf32>
    %39 = math.tanh %38 : vector<8x32xf32>
    %cst_23 = arith.constant 1.000000e+00 : f32
    %40 = vector.broadcast %cst_23 : f32 to vector<8x32xf32>
    %41 = arith.addf %39, %40 : vector<8x32xf32>
    %cst_24 = arith.constant 5.000000e-01 : f32
    %42 = vector.broadcast %cst_24 : f32 to vector<8x32xf32>
    %43 = arith.mulf %42, %41 : vector<8x32xf32>
    %c0_25 = arith.constant 0 : index
    %c0_26 = arith.constant 0 : index
    %44 = vector.load %arg12[%c0_25, %c0_26] : memref<8x32xf32, #tpu.memory_space<vmem>>, vector<8x32xf32>
    %45 = arith.mulf %33, %44 : vector<8x32xf32>
    %46 = arith.mulf %25, %35 : vector<8x32xf32>
    %47 = arith.addf %45, %46 : vector<8x32xf32>
    %48 = math.tanh %47 : vector<8x32xf32>
    %49 = arith.mulf %43, %48 : vector<8x32xf32>
    %c0_27 = arith.constant 0 : index
    %c0_28 = arith.constant 0 : index
    %50 = vector.load %arg11[%c0_27, %c0_28] : memref<8x32xf32, #tpu.memory_space<vmem>>, vector<8x32xf32>
    tpu.vector_store %arg11[%c0_27, %c0_28], %49 {strides = array<i32>} : memref<8x32xf32, #tpu.memory_space<vmem>>, vector<8x32xf32>,
    %c0_29 = arith.constant 0 : index
    %c0_30 = arith.constant 0 : index
    %51 = vector.load %arg12[%c0_29, %c0_30] : memref<8x32xf32, #tpu.memory_space<vmem>>, vector<8x32xf32>
    tpu.vector_store %arg12[%c0_29, %c0_30], %47 {strides = array<i32>} : memref<8x32xf32, #tpu.memory_space<vmem>>, vector<8x32xf32>,
    %c0_31 = arith.constant 0 : index
    %c0_32 = arith.constant 0 : index
    %c0_33 = arith.constant 0 : index
    %52 = vector.load %arg9[%c0_31, %c0_32, %c0_33] : memref<1x8x32xf32, #tpu.memory_space<vmem>>, vector<1x8x32xf32>
    %53 = vector.shape_cast %52 : vector<1x8x32xf32> to vector<8x32xf32>
    %54 = vector.shape_cast %49 : vector<8x32xf32> to vector<1x8x32xf32>
    tpu.vector_store %arg9[%c0_31, %c0_32, %c0_33], %54 {strides = array<i32>} : memref<1x8x32xf32, #tpu.memory_space<vmem>>, vector<1x8x32xf32>,
    %c7_i32 = arith.constant 7 : i32
    %55 = arith.cmpi eq, %arg0, %c7_i32 : i32
    %56 = arith.extui %55 : i1 to i32
    %c0_i32_34 = arith.constant 0 : i32
    %57 = arith.cmpi ne, %56, %c0_i32_34 : i32
    scf.if %57 {
      %c0_35 = arith.constant 0 : index
      %c0_36 = arith.constant 0 : index
      %58 = vector.load %arg10[%c0_35, %c0_36] : memref<8x32xf32, #tpu.memory_space<vmem>>, vector<8x32xf32>
      tpu.vector_store %arg10[%c0_35, %c0_36], %47 {strides = array<i32>} : memref<8x32xf32, #tpu.memory_space<vmem>>, vector<8x32xf32>,
    } else {
    }
    return
  }
  func.func @transform_0(%arg0: i32) -> (i32, i32, i32) {
    %c0_i32 = arith.constant 0 : i32
    %c0_i32_0 = arith.constant 0 : i32
    %c0_i32_1 = arith.constant 0 : i32
    return %arg0, %c0_i32, %c0_i32_0 : i32, i32, i32
  }
  func.func @transform_1(%arg0: i32) -> (i32, i32) {
    %c0_i32 = arith.constant 0 : i32
    %c0_i32_0 = arith.constant 0 : i32
    %c0_i32_1 = arith.constant 0 : i32
    return %c0_i32, %c0_i32_0 : i32, i32
  }
  func.func @transform_2(%arg0: i32) -> (i32, i32) {
    %c0_i32 = arith.constant 0 : i32
    %c0_i32_0 = arith.constant 0 : i32
    %c0_i32_1 = arith.constant 0 : i32
    return %c0_i32, %c0_i32_0 : i32, i32
  }
  func.func @transform_3(%arg0: i32) -> (i32, i32) {
    %c0_i32 = arith.constant 0 : i32
    %c0_i32_0 = arith.constant 0 : i32
    %c0_i32_1 = arith.constant 0 : i32
    return %c0_i32, %c0_i32_0 : i32, i32
  }
  func.func @transform_4(%arg0: i32) -> (i32, i32) {
    %c0_i32 = arith.constant 0 : i32
    %c0_i32_0 = arith.constant 0 : i32
    %c0_i32_1 = arith.constant 0 : i32
    return %c0_i32, %c0_i32_0 : i32, i32
  }
  func.func @transform_5(%arg0: i32) -> (i32, i32) {
    %c0_i32 = arith.constant 0 : i32
    %c0_i32_0 = arith.constant 0 : i32
    %c0_i32_1 = arith.constant 0 : i32
    return %c0_i32, %c0_i32_0 : i32, i32
  }
  func.func @transform_6(%arg0: i32) -> (i32, i32) {
    %c0_i32 = arith.constant 0 : i32
    %c0_i32_0 = arith.constant 0 : i32
    %c0_i32_1 = arith.constant 0 : i32
    return %c0_i32, %c0_i32_0 : i32, i32
  }
  func.func @transform_7(%arg0: i32) -> (i32, i32) {
    %c0_i32 = arith.constant 0 : i32
    %c0_i32_0 = arith.constant 0 : i32
    %c0_i32_1 = arith.constant 0 : i32
    return %c0_i32, %c0_i32_0 : i32, i32
  }
  func.func @transform_8(%arg0: i32) -> (i32, i32, i32) {
    %c0_i32 = arith.constant 0 : i32
    %c0_i32_0 = arith.constant 0 : i32
    %c0_i32_1 = arith.constant 0 : i32
    return %arg0, %c0_i32, %c0_i32_0 : i32, i32, i32
  }
  func.func @transform_9(%arg0: i32) -> (i32, i32) {
    %c0_i32 = arith.constant 0 : i32
    %c0_i32_0 = arith.constant 0 : i32
    %c0_i32_1 = arith.constant 0 : i32
    return %c0_i32, %c0_i32_0 : i32, i32
  }
}

</mosaic_0001>

<bundles_post_ra>
// kernel: tpu_custom_call.1
= control target key start
LH: loop header
LB: loop body
LE: loop exit
PB: predicated region body
PF: predicated region fallthrough
CT: control target
= control target key end

     0   :  { %s1068_s0 = inlined_call_operand.vmem [shape: f32[8,8,4], index: 0, kind: input, shape index: {}]   ;;  %s1069_s1 = inlined_call_operand.vmem [shape: f32[8,32], index: 1, kind: input, shape index: {}]   ;;  %s1070_s2 = inlined_call_operand.vmem [shape: f32[8,32], index: 2, kind: input, shape index: {}]   ;;  %s1071_s3 = inlined_call_operand.vmem [shape: f32[4,128], index: 3, kind: input, shape index: {}]   ;;  %s1072_s4 = inlined_call_operand.vmem [shape: f32[32,128], index: 4, kind: input, shape index: {}]   ;;  %s1073_s5 = inlined_call_operand.vmem [shape: f32[1,128], index: 5, kind: input, shape index: {}]   ;;  %s1074_s6 = inlined_call_operand.vmem [shape: f32[8,4], index: 6, kind: input, shape index: {}]   ;;  %s1075_s7 = inlined_call_operand.vmem [shape: f32[8,32], index: 7, kind: input, shape index: {}]   ;;  %s1076_s8 = inlined_call_operand.hbm [shape: f32[8,8,32], index: 8, kind: output, shape index: {0}]   ;;  %s1077_s9 = inlined_call_operand.hbm [shape: f32[8,32], index: 9, kind: output, shape index: {1}]  }
   0x1   :  { %1079 = sst [smem:[#allocation10_spill]] %s1068_s0 }
   0x2   :  { %15 = vsyncpa [#allocation5], 0 }
   0x3   :  { %17 = vsyncpa [#allocation5 + $0x1], 0 }
   0x4   :  { %18 = vsyncpa [#allocation7], 0  ;;  %s902_s30 = smov 0   ;;  %s904_s10 = smov 0  }
   0x5   :  { %s906_s11 = smov 0   ;;  %s908_s12 = smov 0  }
   0x6 LB: > { %s923_s13 = sadd.s32 4294967295, %s842_s12   ;;  %s645_s14 = sadd.s32 4294967294, %s842_s12   ;;  %s842_s12 = sphi %s908_s12, %s1090_s12   ;;  %s838_s11 = sphi %s906_s11, %s1089_s11   ;;  %s834_s10 = sphi %s904_s10, %s1088_s10   ;;  %s830_s30 = sphi %s902_s30, %s1087_s30  }
   0x7   : > { %s927_s15 = sadd.s32 1, %s842_s12   ;;  %s204_s16 = sadd.s32 1, %s838_s11 }
   0x8   : > { %s201_s17 = ssub.s32 %s842_s12, %s927_s15  ;;  %p214_p0 = scmp.ne.s32.totalorder %s838_s11, %s834_s10 }
   0x9   : > { %p202_p1 = scmp.eq.s32.totalorder %s201_s17, 0  ;;  %p215_p2 = scmp.eq.s32.totalorder %s923_s13, 7 }
   0xa   : > { %p220_p3 = scmp.ne.s32.totalorder %s834_s10, %s830_s30  ;;  %p221_p4 = scmp.eq.s32.totalorder %s645_s14, 7 }
   0xb   : > { %s938_s18 = scalar_select %p202_p1, %s838_s11, %s204_s16  }
   0xc   : > { %p942_p5 = por %p215_p2, %p214_p0  ;;  %p946_p6 = por %p221_p4, %p220_p3 }
   0xd   : > { %p648_p7 = scmp.ge.s32.totalorder %s842_s12, 1  ;;  %p288_p8 = scmp.lt.s32.totalorder %s842_s12, 9 }
   0xe   : > { %s1081_s20 = scalar_select %p946_p6, 1, 0 }
   0xf   : > { %p289_p9 = pnand %p648_p7, %p288_p8 }
  0x10   : > { %s1078_s21 = sand.u32 (!%p289_p9), 1, %s834_s10   ;;  %p323_p10 = scmp.lt.s32.totalorder (!%p289_p9), %s923_s13, 7 }
  0x11   : > { %292 = sbr.rel (%p289_p9) target bundleno = 798 (0x31e), region = 52  ;;  %s956_s22 = sshll.u32 (!%p289_p9), %s1078_s21, 3 }
  0x12   : > { %s1082_s0 = sld [smem:[#allocation10_spill]] (!%p289_p9)  ;;  %p651_p11 = scmp.ne.s32.totalorder (!%p289_p9), %s923_s13, 0 }
  0x18   : > { %s324_s23 = scalar_select %p323_p10, %s923_s13, 7 }
  0x19   : > { %330 = sbr.rel (%p651_p11) target bundleno = 32 (0x20), region = 56  ;;  %v331_v0 = vld [vmem:[%s1069_s1] sm:$0xff] (!%p651_p11)  ;;  %vm332_vm0 = vcmask (!%p651_p11), 261120  }
  0x1a   : > { %s650_s24 = sshll.u32 %s324_s23, 3  ;;  %v334_v1 = vld [vmem:[%s1070_s2] sm:$0xff] (!%p651_p11)  ;;  %333 = vst.msk [vmem:[#allocation2] sm:$0xff] (!%p651_p11), %vm332_vm0, %v331_v0 }
  0x1b   : > { %s326_s27 = scalar_lea.vmem %s1082_s0, %s650_s24  ;;  %335 = vst.msk [vmem:[#allocation3] sm:$0xff] (!%p651_p11), %vm332_vm0, %v334_v1 }
  0x20 PF: > { %v343_v2 = vld [vmem:[%s1072_s4] sm:$0xff]  ;;  %v344_v3 = vld [vmem:[%s1072_s4 + $0x8] sm:$0xff]  ;;  %v345_v4 = vld [vmem:[%s1072_s4 + $0x10] sm:$0xff]  ;;  %vm425_vm1 = vcmask 1043456   ;;  %v844_v5 = vmov 0.0|0.0   ;;  %v845_v8 = vmov 0.0  }
  0x21   : > { %686 = vmatprep.subr.bf16.mxu0 %v844_v5  ;;  %v687_v6 = vpack.c.bf16 %v344_v3, %v343_v2  ;;  %v346_v7 = vld [vmem:[%s1072_s4 + $0x18] sm:$0xff]  ;;  %681 = vmatprep.subr.mxu1 %v845_v8  ;;  %v342_v9 = vld [vmem:[%s1071_s3] sm:$0xf]  ;;  %vm846_vm2 = vmmov 0   ;;  %vm421_vm3 = vcmask 31744   ;;  %vm347_vm4 = vcmask 261120  }
  0x22   : > { %v336_v10 = vld [vmem:[%s326_s27] sm:$0xff]  ;;  %682 = vmatpush3.msk.msra.mxu1 %vm425_vm1, %v342_v9  ;;  %683 = vmatprep.mubr.msk.f32.mxu1 %vm846_vm2, %v845_v8  ;;  %v690_v12 = vpack.c.bf16 %v346_v7, %v345_v4  ;;  %s847_s26 = smov 64   ;;  %v512_v25 = vld [vmem:[#allocation3] sm:$0xff]  ;;  %s848_s29 = smov 32  }
  0x23   : > { %v337_v11 = vld [vmem:[%s1074_s6] sm:$0xff]  ;;  %688 = vmatpush3.bf16.msra.mxu0 %v687_v6  ;;  %678 = vmatprep.mubr.msk.f32.mxu0 %vm846_vm2, %v845_v8  ;;  %s849_s14 = smov 96   ;;  %s1083_s21 = scalar_lea.vmem [#allocation4], %s956_s22 }
  0x24   : > { %v338_v13 = vmul.f32 %v337_v11, %v336_v10  ;;  %v339_v14 = vld [vmem:[#allocation2] sm:$0xff]  ;;  %689 = vmatprep.subr.bf16.mxu0 %v844_v5  ;;  %p656_p12 = scmp.ne.s32.totalorder %s923_s13, 7 }
  0x25   : > { %v340_v15 = vld [vmem:[%s1075_s7] sm:$0xff] }
  0x26   : > { %684 = vmatmul.mubr.msk.f32.vlgmr.msra.gmra.mrb[0].mxu1 %vm421_vm3, %v338_v13  ;;  %v341_v16 = vmul.f32 %v340_v15, %v339_v14  ;;  %v655_v20 = vld [vmem:[%s1073_s5] ss:$0 sm:$0xff] }
  0x27   : > { %691 = vmatpush3.bf16.msra.mxu0 %v690_v12 }
  0x2a   : > { %679 = vmatmul.mubr.msk.f32.vlgmr.msra.gmra.mrb[0].mxu0 %vm347_vm4, %v341_v16 }
  0xf9   : > { %v495_v17 = vpop.f32.mrb[0].mxu1 }
  0xfa   : > { %v685_v18 = vpop.f32.mrb[1].mxu1 }
  0xfd   : > { %v417_v19 = vpop.f32.mrb[0].mxu0 }
  0xfe   : > { %v496_v21 = vadd.f32 %v495_v17, %v417_v19  ;;  %v680_v22 = vpop.f32.mrb[1].mxu0 }
 0x100   : > { %v506_v23 = vadd.f32 %v655_v20, %v496_v21 }
 0x102   : > { %744 = vtanh.f32 %v506_v23  ;;  %v507_v26 = vmul.f32 0.5, %v506_v23 }
 0x104   : > { %746 = vtanh.f32 %v507_v26 }
 0x10c   : > { %v745_v24 = vpop.eup %744 }
 0x10d   : > { %519 = vrot.lane.b32.xlu0 %v745_v24, %s847_s26 }
 0x10e   : > { %v747_v27 = vpop.eup %746 }
 0x10f   : > { %v509_v28 = vadd.f32 1.0, %v747_v27 }
 0x111   : > { %514 = vrot.lane.b32.xlu0 %v512_v25, %s848_s29  ;;  %v510_v29 = vmul.f32 0.5, %v509_v28 }
 0x17f   : > { %v520_v30 = vpop.permute.xlu0 %519 }
 0x180   : > { %v522_v31 = vmul.f32 %v520_v30, %v510_v29 }
 0x182   : > { %524 = vrot.lane.b32.xlu1 %v522_v31, %s848_s29 }
 0x183   : > { %v515_v32 = vpop.permute.xlu0 %514 }
 0x184   : > { %v517_v33 = vmul.f32 %v515_v32, %v510_v29 }
 0x1f4   : > { %v525_v34 = vpop.permute.xlu1 %524 }
 0x1f5   : > { %v527_v35 = vadd.f32 %v525_v34, %v517_v33 }
 0x1f7   : > { %748 = vtanh.f32 %v527_v35 }
 0x201   : > { %v749_v36 = vpop.eup %748 }
 0x202   : > { %530 = vrot.lane.b32.xlu1 %v749_v36, %s847_s26 }
 0x206   : > { %540 = vrot.lane.b32.xlu1 %v527_v35, %s849_s14 }
 0x274   : > { %v531_v37 = vpop.permute.xlu1 %530 }
 0x275   : > { %v533_v38 = vmul.f32 %v531_v37, %v510_v29 }
 0x277   : > { %535 = vrot.lane.b32.xlu0 %v533_v38, %s848_s29 }
 0x278   : > { %v541_v39 = vpop.permute.xlu1 %540 }
 0x279   : > { %543 = vst.msk [vmem:[#allocation3] sm:$0xff] %vm347_vm4, %v541_v39  ;;  %549 = vst.msk [vmem:[#allocation6] sm:$0xff] (!%p656_p12), %vm347_vm4, %v541_v39 }
 0x2e4   : > { %548 = sbr.rel (%p656_p12) target bundleno = 747 (0x2eb), region = 60 }
 0x2e9   : > { %v536_v40 = vpop.permute.xlu0 %535 }
 0x2ea   : > { %538 = vst.msk [vmem:[#allocation2] sm:$0xff] %vm347_vm4, %v536_v40  ;;  %544 = vst.msk [vmem:[%s1083_s21] sm:$0xff] %vm347_vm4, %v536_v40 }
 0x2eb PF: > { %s658_s16 = sshll.u32 %s923_s13, 7  ;;  %s1084_s24 = scalar_lea.vmem [#allocation4], %s956_s22 }
 0x2ec   : > { %s1006_s23 = scalar_lea.hbm %s1076_s8, %s658_s16  ;;  %s564_s27 = sshll.u32 %s1084_s24, 4  ;;  %s565_s27 = int_to_ptr.vmem [resolvable:$true] %s564_s27 }
 0x2ed   : > { %s1085_s25 = sand.u32 1, %s834_s10   ;;  %s750_s29 = scalar_lea.vmem %s565_s27, 128 }
 0x2ee   : > { %s551_s26 = scalar_lea.sflag [#allocation5], %s1085_s25  ;;  %p751_p13 = scmp.ne.s32.totalorder %s565_s27, %s750_s29 }
 0x2ef   : > { %s850_s14 = smov [#allocation4]  }
 0x2f0   : > { %p752_p0 = pnand %p751_p13, %p942_p5  ;;  %s754_s21 = sshll.u32 %s850_s14, 4  ;;  %s755_s21 = int_to_ptr.vmem [resolvable:$false] %s754_s21 }
 0x2f1   : > { %s756_s0 = scalar_lea.vmem %s755_s21, 256  ;;  %p757_p3 = scmp.lt.s32.totalorder %s565_s27, %s755_s21 }
 0x2f2   : > { %p753_p1 = pneg %p752_p0  ;;  %p758_p4 = scmp.lt.s32.totalorder %s756_s0, %s750_s29 }
 0x2f4   : > { %p759_p7 = por %p758_p4, %p757_p3 }
 0x2f6   : > { %p760_p8 = pnand %p759_p7, %p753_p1 }
 0x2f8   : > { %763 = shalt.err (!%p760_p8)
}
 0x2f9   : > { %s764_s22 = scalar_lea.hbm %s1006_s23, 128  ;;  %s768_s17 = scalar_lea.hbm %s1076_s8, 1024 }
 0x2fa   : > { %p765_p9 = scmp.ne.s32.totalorder %s1006_s23, %s764_s22  ;;  %p769_p12 = scmp.lt.u32.totalorder %s1006_s23, %s1076_s8 }
 0x2fb   : > { %p770_p13 = scmp.lt.u32.totalorder %s768_s17, %s764_s22  ;;  %p772_p1 = scmp.lt.u32.totalorder %s764_s22, %s1006_s23 }
 0x2fc   : > { %p766_p10 = pnand %p765_p9, %p942_p5 }
 0x2fd   : > { %p771_p0 = por %p770_p13, %p769_p12 }
 0x2fe   : > { %p767_p11 = pneg %p766_p10 }
 0x2ff   : > { %p773_p3 = por %p772_p1, %p771_p0 }
 0x301   : > { %p774_p4 = pnand %p773_p3, %p767_p11 }
 0x303   : > { %777 = shalt.err (!%p774_p4)
}
 0x304   : > { %692 = dma.vmem_to_hbm [thread:$0]  (%p942_p5), %s565_s27, 128, %s1006_s23, %s551_s26  }
 0x305   : > { %s851_s0 = smov [#allocation6]  }
 0x306   : > { %s575_s29 = sshll.u32 %s851_s0, 4  ;;  %s576_s29 = int_to_ptr.vmem [resolvable:$true] %s575_s29 }
 0x307   : > { %s778_s14 = scalar_lea.vmem %s576_s29, 128  ;;  %p785_p10 = scmp.lt.s32.totalorder %s576_s29, %s576_s29 }
 0x308   : > { %p779_p7 = scmp.ne.s32.totalorder %s576_s29, %s778_s14  ;;  %p786_p6 = scmp.lt.s32.totalorder %s778_s14, %s778_s14 }
 0x30a   : > { %p780_p8 = pnand %p779_p7, %p215_p2  ;;  %p787_p12 = por %p786_p6, %p785_p10 }
 0x30c   : > { %p781_p9 = pneg %p780_p8 }
 0x30e   : > { %p788_p13 = pnand %p787_p12, %p781_p9 }
 0x310   : > { %791 = shalt.err (!%p788_p13)
}
 0x311   : > { %s792_s19 = scalar_lea.hbm %s1077_s9, 128 }
 0x312   : > { %p793_p5 = scmp.ne.s32.totalorder %s1077_s9, %s792_s19  ;;  %p798_p1 = scmp.lt.u32.totalorder %s792_s19, %s1077_s9 }
 0x314   : > { %p794_p11 = pnand %p793_p5, %p215_p2 }
 0x316   : > { %p795_p0 = pneg %p794_p11 }
 0x318   : > { %p800_p3 = pnand %p798_p1, %p795_p0 }
 0x31a   : > { %803 = shalt.err (!%p800_p3)
}
 0x31b   : > { %694 = dma.vmem_to_hbm [thread:$0]  (%p215_p2), %s576_s29, 128, %s1077_s9, [#allocation7]  }
 0x31c   : > { %821 = dma.done.wait (%p215_p2), [#allocation7], 128  }
 0x31d   : > { %823 = vsyncadd (%p215_p2), [#allocation7], 4294967168 }
 0x31e PF: > { %p704_p6 = scmp.ge.s32.totalorder %s842_s12, 2  ;;  %s591_s24 = sand.u32 1, %s830_s30  }
 0x31f   : > { %p1086_p4 = scmp.ne.s32.totalorder %s1081_s20, 0  ;;  %s592_s25 = scalar_lea.sflag [#allocation5], %s591_s24 }
 0x321   : > { %p699_p7 = pnand %p704_p6, %p1086_p4 }
 0x323   : > { %825 = dma.done.wait (!%p699_p7), %s592_s25, 128  }
 0x324   : > { %827 = vsyncadd (!%p699_p7), %s592_s25, 4294967168  ;;  %p21_p8 = scmp.ge.s32.totalorder %s927_s15, 10   ;;  %s1087_s30 = smov %s834_s10 }
 0x325   : > { %s1088_s10 = smov %s838_s11  ;;  %s1089_s11 = smov %s938_s18 }
 0x326   : > { %s1090_s12 = smov %s927_s15  ;;  %23 = sbr.rel (!%p21_p8) target bundleno = 6 (0x6), region = 103 }
 0x32d   :  { %597 = vsyncpa [#allocation5], 1 }
 0x32e   :  { %599 = vsyncpa [#allocation5 + $0x1], 1 }
 0x32f   :  { %600 = vsyncpa [#allocation7], 1 }

</bundles_post_ra>
